<compile_context>
chip_gen: v7x
topology: tpu7x:2x2x1
jax: 0.10.0
libtpu: 0.0.40
codegen_flags: <defaults>
</compile_context>

<pallas_src>
import math

import jax
import jax.numpy as jnp
from jax import lax
from jax.experimental import pallas as pl
from jax.experimental.pallas import tpu as pltpu

_MIB = 1024 * 1024


def _make_embedding_kernel(vocab_size: int, use_one_hot: bool):
    def embedding_kernel(ids_ref, table_ref, out_ref):
        # ids block: (tok_blk, 1) int32.  Clamp so padded / out-of-range ids
        # never index outside the table (VMEM has no runtime bounds check).
        ids = jnp.clip(ids_ref[...], 0, vocab_size - 1)           # (tok_blk, 1)
        table = table_ref[...]                                     # (V, E) resident

        if use_one_hot:
            # Small-vocab path: gather via one MXU pass.  iota is a single
            # (1, V) lane row; the compare broadcasts it, so no (tok_blk, V)
            # iota intermediate is regenerated per grid step.
            lane_iota = lax.broadcasted_iota(jnp.int32, (1, vocab_size), 1)
            onehot = (ids == lane_iota).astype(table.dtype)        # (tok_blk, V)
            rows = jnp.dot(
                onehot, table,
                precision=jax.lax.Precision.HIGHEST,
                preferred_element_type=jnp.float32,
            )
        else:
            # Direct row gather on the VMEM-resident table: O(tok_blk * E).
            rows = jnp.take(table, ids[:, 0], axis=0, mode="clip")

        out_ref[...] = rows.astype(out_ref.dtype)

    return embedding_kernel


def _vmem_limit_bytes() -> int:
    """Per-chip VMEM budget: ~75% of physical capacity, capped at 96 MiB."""
    cap = 64 * _MIB
    try:
        cap = int(getattr(pltpu.get_tpu_info(), "vmem_capacity_bytes", cap) or cap)
    except Exception:
        pass
    return max(32 * _MIB, min((cap * 3) // 4, 96 * _MIB))


def _pick_tok_blk(num_tokens: int, max_block_tokens: int) -> int:
    """Largest block <= min(1024, VMEM cap) that is a multiple of 8, preferring
    an exact divisor of num_tokens so no padding / post-kernel slice is needed."""
    round8 = lambda n: ((n + 7) // 8) * 8
    target = max(8, min(1024, (max_block_tokens // 8) * 8, round8(num_tokens)))
    for blk in range(target, 7, -8):
        if num_tokens % blk == 0:
            return blk
    return target


def embedding_lookup(ids: jax.Array, table: jax.Array, *,
                     one_hot_max_vocab: int = 512) -> jax.Array:
    """ids: int array of any shape, table: (V, E) -> ids.shape + (E,)."""
    V, E = table.shape
    lead_shape = ids.shape
    num_tokens = math.prod(lead_shape)
    itemsize = table.dtype.itemsize

    use_one_hot = V <= one_hot_max_vocab
    vmem_limit = _vmem_limit_bytes()

    # VMEM budget: one resident table copy + double-buffered output tiles +
    # double-buffered ids column (+ one-hot intermediates on the small-V path).
    table_bytes = V * E * itemsize
    headroom = 8 * _MIB
    if table_bytes + headroom > vmem_limit:
        # TODO(synk): HBM-resident table + per-row DMA gather for huge vocabularies.
        raise NotImplementedError(
            "embedding table does not fit in VMEM; HBM DMA-gather not implemented")
    per_token_bytes = 2 * E * itemsize + 2 * 4
    if use_one_hot:
        per_token_bytes += 2 * V * 4
    max_block_tokens = (vmem_limit - table_bytes - headroom) // per_token_bytes

    tok_blk = _pick_tok_blk(num_tokens, max_block_tokens)
    num_blocks = pl.cdiv(num_tokens, tok_blk)
    padded_tokens = num_blocks * tok_blk

    ids_flat = ids.reshape(num_tokens).astype(jnp.int32)
    if padded_tokens != num_tokens:
        ids_flat = jnp.pad(ids_flat, (0, padded_tokens - num_tokens))
    ids_col = ids_flat.reshape(padded_tokens, 1)  # last dim == full dim -> legal block

    out_flat = pl.pallas_call(
        _make_embedding_kernel(V, use_one_hot),
        out_shape=jax.ShapeDtypeStruct((padded_tokens, E), table.dtype),
        grid=(num_blocks,),
        in_specs=[
            # Per-block token ids, pipelined like any other input.
            pl.BlockSpec((tok_blk, 1), lambda i: (i, 0)),
            # Whole table resident in VMEM as one copy (not double-buffered).
            pl.BlockSpec(memory_space=pltpu.MemorySpace.VMEM),
        ],
        out_specs=pl.BlockSpec((tok_blk, E), lambda i: (i, 0)),
        compiler_params=pltpu.CompilerParams(
            dimension_semantics=("parallel",),   # token blocks shard across TCs
            vmem_limit_bytes=vmem_limit,
        ),
    )(ids_col, table)

    if padded_tokens != num_tokens:
        # Only pay the slice copy when no padding-free block size exists.
        out_flat = out_flat[:num_tokens]
    return out_flat.reshape(*lead_shape, E)


class Embedding:
    """JAX/Pallas equivalent of the PyTorch Embedding module."""

    def __init__(self, vocab_size: int, embed_size: int, key: jax.Array):
        # nn.Embedding default init: weight ~ N(0, 1)
        self.table = jax.random.normal(key, (vocab_size, embed_size), dtype=jnp.float32)

    def __call__(self, input_ids: jax.Array) -> jax.Array:
        return embedding_lookup(input_ids, self.table)


if __name__ == "__main__":
    vocab_size = 256
    embed_size = 128
    batch, seq = 2, 8

    key = jax.random.PRNGKey(0)
    k_table, k_ids = jax.random.split(key)

    module = Embedding(vocab_size, embed_size, k_table)
    input_ids = jax.random.randint(k_ids, (batch, seq), 0, vocab_size, dtype=jnp.int32)

    out = module(input_ids)
    out = jax.block_until_ready(out)

    # Sanity check against a plain JAX gather.
    ref = module.table[input_ids]
    assert out.shape == (batch, seq, embed_size)
    assert out.dtype == jnp.float32
    assert bool(jnp.allclose(out, ref)), "Pallas embedding mismatch vs reference"

    print("KERNEL_OK")
</pallas_src>

<mosaic_0001>
module attributes {stable_mosaic.version = 11 : i64} {
  func.func @embedding_kernel(%arg0: i32, %arg1: memref<16x1xi32, #tpu.memory_space<vmem>>, %arg2: memref<256x128xf32, #tpu.memory_space<vmem>>, %arg3: memref<16x128xf32, #tpu.memory_space<vmem>>) attributes {dimension_semantics = [#tpu.dimension_semantics<parallel>], iteration_bounds = array<i64: 1>, scalar_prefetch = 0 : i64, scratch_operands = 0 : i64, tpu.core_type = #tpu.core_type<tc>, window_params = [{transform_indices = @transform_0, window_bounds = array<i64: 16, 1>}, {pipeline_mode = #tpu.pipeline_mode<synchronous>, transform_indices = @transform_1, window_bounds = array<i64: 256, 128>}, {transform_indices = @transform_2, window_bounds = array<i64: 16, 128>}]} {
    %c0 = arith.constant 0 : index
    %c0_0 = arith.constant 0 : index
    %0 = vector.load %arg1[%c0, %c0_0] : memref<16x1xi32, #tpu.memory_space<vmem>>, vector<16x1xi32>
    %c0_i32 = arith.constant 0 : i32
    %c255_i32 = arith.constant 255 : i32
    %1 = vector.broadcast %c0_i32 : i32 to vector<16x1xi32>
    %2 = arith.maxsi %1, %0 : vector<16x1xi32>
    %3 = vector.broadcast %c255_i32 : i32 to vector<16x1xi32>
    %4 = arith.minsi %3, %2 : vector<16x1xi32>
    %c0_1 = arith.constant 0 : index
    %c0_2 = arith.constant 0 : index
    %5 = vector.load %arg2[%c0_1, %c0_2] : memref<256x128xf32, #tpu.memory_space<vmem>>, vector<256x128xf32>
    %6 = tpu.iota {dimensions = array<i32: 1>} : vector<1x256xi32>
    %7 = vector.broadcast %4 : vector<16x1xi32> to vector<16x256xi32>
    %8 = vector.broadcast %6 : vector<1x256xi32> to vector<16x256xi32>
    %9 = arith.cmpi eq, %7, %8 : vector<16x256xi32>
    %10 = arith.extui %9 : vector<16x256xi1> to vector<16x256xi32>
    %11 = arith.sitofp %10 : vector<16x256xi32> to vector<16x256xf32>
    %cst = arith.constant dense<0.000000e+00> : vector<16x128xf32>
    %12 = tpu.matmul %11, %5, %cst {dimension_numbers = #tpu.dot_dimension_numbers<[1], [0], [0], [1], [0, 0, 1, 1], [], []>, precision = #tpu.contract_precision<fp32>} : vector<16x256xf32>, vector<256x128xf32>, vector<16x128xf32> -> vector<16x128xf32>
    %c0_3 = arith.constant 0 : index
    %c0_4 = arith.constant 0 : index
    %13 = vector.load %arg3[%c0_3, %c0_4] : memref<16x128xf32, #tpu.memory_space<vmem>>, vector<16x128xf32>
    tpu.vector_store %arg3[%c0_3, %c0_4], %12 {strides = array<i32>} : memref<16x128xf32, #tpu.memory_space<vmem>>, vector<16x128xf32>,
    return
  }
  func.func @transform_0(%arg0: i32) -> (i32, i32) {
    %c0_i32 = arith.constant 0 : i32
    %c0_i32_0 = arith.constant 0 : i32
    return %arg0, %c0_i32 : i32, i32
  }
  func.func @transform_1(%arg0: i32) -> (i32, i32) {
    %c0_i32 = arith.constant 0 : i32
    %c0_i32_0 = arith.constant 0 : i32
    %c0_i32_1 = arith.constant 0 : i32
    return %c0_i32, %c0_i32_0 : i32, i32
  }
  func.func @transform_2(%arg0: i32) -> (i32, i32) {
    %c0_i32 = arith.constant 0 : i32
    %c0_i32_0 = arith.constant 0 : i32
    return %arg0, %c0_i32 : i32, i32
  }
}

</mosaic_0001>

<bundles_post_ra>
// kernel: tpu_custom_call.1
= control target key start
LH: loop header
LB: loop body
LE: loop exit
PB: predicated region body
PF: predicated region fallthrough
CT: control target
= control target key end

     0   :  { %7 = vsyncpa [#allocation3], 0  ;;  %s2319_s0 = inlined_call_operand.vmem [shape: s32[16,1], index: 0, kind: input, shape index: {}]   ;;  %s2320_s1 = inlined_call_operand.hbm [shape: f32[256,128], index: 1, kind: input, shape index: {}]   ;;  %s2321_s2 = inlined_call_operand.hbm [shape: f32[16,128], index: 2, kind: output, shape index: {}]  }
   0x1   :  { %8 = vsyncpa [#allocation4], 0  ;;  %s1518_s9 = smov [#allocation2]   ;;  %s1470_s13 = scalar_lea.hbm %s2320_s1, 4096 }
   0x2   :  { %s16_s10 = sshll.u32 %s1518_s9, 4  ;;  %p1471_p0 = scmp.ne.s32.totalorder %s2320_s1, %s1470_s13  ;;  %s17_s10 = int_to_ptr.vmem [resolvable:$true] %s16_s10 }
   0x3   :  { %p1474_p1 = scmp.lt.u32.totalorder %s1470_s13, %s2320_s1 }
   0x5   :  { %p1476_p2 = pnand %p1474_p1, %p1471_p0 }
   0x7   :  { %1479 = shalt.err (!%p1476_p2)
}
   0x8   :  { %s1480_s18 = scalar_lea.vmem %s17_s10, 4096  ;;  %p1485_p4 = scmp.lt.s32.totalorder %s17_s10, %s17_s10 }
   0x9   :  { %p1481_p3 = scmp.ne.s32.totalorder %s17_s10, %s1480_s18  ;;  %p1486_p5 = scmp.lt.s32.totalorder %s1480_s18, %s1480_s18 }
   0xb   :  { %p1487_p6 = por %p1486_p5, %p1485_p4 }
   0xd   :  { %p1488_p7 = pnand %p1487_p6, %p1481_p3 }
   0xf   :  { %1491 = shalt.err (!%p1488_p7)
}
  0x10   :  { %s1519_s19 = smov 128   ;;  %s1520_s20 = smov 8  }
  0x11   :  { %22 = dma.hbm_to_vmem [thread:$0]  %s2320_s1, 4096, %s17_s10, [#allocation3], %s1519_s19, %s1519_s19, %s1520_s20  }
  0x12   :  { %1514 = dma.done.wait [#allocation3], 4096  }
  0x13   :  { %1515 = vsyncadd [#allocation3], 4294963200  ;;  %v1521_v0 = vmov 0   ;;  %v26_v1 = vld [vmem:[%s2319_s0] sm:$0xff]  ;;  %v27_v2 = vld [vmem:[%s2319_s0 + $0x8] sm:$0xff]  ;;  %s1524_s0 = smov [#allocation5]  }
  0x14   :  { %1469 = vset.pattern.permute.xlu0 %v1521_v0  ;;  %v1561_v3 = vld [vmem:[#allocation2 + $0x80] sm:$0xff]  ;;  %vm28_vm0 = vcmp.gt.s32.totalorder %v26_v1, 0  ;;  %vm30_vm1 = vcmp.gt.s32.totalorder %v27_v2, 0  ;;  %v1563_v4 = vld [vmem:[#allocation2 + $0x88] sm:$0xff]  ;;  %v1572_v12 = vld [vmem:[#allocation2 + $0x90] sm:$0xff]  ;;  %s1014_s1 = sshll.u32 %s1524_s0, 4  ;;  %s1015_s1 = int_to_ptr.vmem [resolvable:$true] %s1014_s1 }
  0x15   :  { %v138_v5 = vand.u32 4294901760, %v1561_v3  ;;  %v1566_v6 = vld [vmem:[#allocation2] sm:$0xff]  ;;  %v1568_v7 = vld [vmem:[#allocation2 + $0x8] sm:$0xff]  ;;  %v29_v8 = vsel %vm28_vm0, %v26_v1, 0  ;;  %v31_v9 = vsel %vm30_vm1, %v27_v2, 0  ;;  %v141_v10 = vand.u32 4294901760, %v1563_v4  ;;  %p1497_p9 = scmp.lt.s32.totalorder %s1015_s1, %s1015_s1 }
  0x16   :  { %v90_v11 = vand.u32 4294901760, %v1566_v6  ;;  %v1574_v13 = vld [vmem:[#allocation2 + $0x98] sm:$0xff]  ;;  %vm32_vm2 = vcmp.lt.s32.totalorder %v29_v8, 255  ;;  %vm34_vm3 = vcmp.lt.s32.totalorder %v31_v9, 255  ;;  %v93_v15 = vand.u32 4294901760, %v1568_v7  ;;  %v1582_v16 = vld [vmem:[#allocation2 + $0x10] sm:$0xff] }
  0x17   :  { %v1579_v14 = vsub.f32 %v1561_v3, %v138_v5  ;;  %v1584_v17 = vld [vmem:[#allocation2 + $0x18] sm:$0xff]  ;;  %v33_v18 = vsel %vm32_vm2, %v29_v8, 255  ;;  %v35_v19 = vsel %vm34_vm3, %v31_v9, 255  ;;  %v1587_v20 = vsub.f32 %v1563_v4, %v141_v10  ;;  %v1636_v38 = vld [vmem:[#allocation2 + $0xa0] sm:$0xff]  ;;  %v1643_v43 = vld [vmem:[#allocation2 + $0xa8] sm:$0xff]  ;;  %s1492_s27 = scalar_lea.vmem %s1015_s1, 256 }
  0x18   :  { %v1592_v21 = vsub.f32 %v1566_v6, %v90_v11  ;;  %72 = vperm.xlu0 %1469, %v33_v18   ;;  %v1598_v23 = vsub.f32 %v1568_v7, %v93_v15  ;;  %v144_v24 = vand.u32 4294901760, %v1572_v12  ;;  %v147_v25 = vand.u32 4294901760, %v1574_v13  ;;  %v1661_v56 = vld [vmem:[#allocation2 + $0x20] sm:$0xff]  ;;  %v1663_v57 = vld [vmem:[#allocation2 + $0x28] sm:$0xff]  ;;  %v1670_v62 = vld [vmem:[#allocation2 + $0xb0] sm:$0xff]  ;;  %p1493_p8 = scmp.ne.s32.totalorder %s1015_s1, %s1492_s27  ;;  %p1498_p10 = scmp.lt.s32.totalorder %s1492_s27, %s1492_s27 }
  0x19   :  { %v2341_v22 = vand.u32 4294901760, %v1579_v14  ;;  %v2340_v26 = vand.u32 4294901760, %v1587_v20  ;;  %v96_v28 = vand.u32 4294901760, %v1582_v16  ;;  %v99_v29 = vand.u32 4294901760, %v1584_v17  ;;  %v1681_v4 = vld [vmem:[#allocation2 + $0xb8] sm:$0xff] }
  0x1a   :  { %v2338_v27 = vand.u32 4294901760, %v1592_v21  ;;  %v2337_v31 = vand.u32 4294901760, %v1598_v23  ;;  %v1613_v32 = vsub.f32 %v1572_v12, %v144_v24  ;;  %v1618_v33 = vsub.f32 %v1574_v13, %v147_v25  ;;  %p1499_p11 = por %p1498_p10, %p1497_p9 }
  0x1b   :  { %v332_v30 = vsub.f32 %v1579_v14, %v2341_v22  ;;  %v339_v34 = vsub.f32 %v1587_v20, %v2340_v26  ;;  %v1629_v36 = vsub.f32 %v1582_v16, %v96_v28  ;;  %v1634_v37 = vsub.f32 %v1584_v17, %v99_v29 }
  0x1c   :  { %v220_v35 = vsub.f32 %v1592_v21, %v2338_v27  ;;  %75 = vperm.xlu0 %1469, %v35_v19   ;;  %v227_v40 = vsub.f32 %v1598_v23, %v2337_v31  ;;  %v2335_v41 = vand.u32 4294901760, %v1613_v32  ;;  %v2334_v42 = vand.u32 4294901760, %v1618_v33  ;;  %p1500_p12 = pnand %p1499_p11, %p1493_p8 }
  0x1d   :  { %v333_v39 = vand.u32 4294901760, %v332_v30  ;;  %v340_v44 = vand.u32 4294901760, %v339_v34  ;;  %v2332_v46 = vand.u32 4294901760, %v1629_v36  ;;  %v2331_v47 = vand.u32 4294901760, %v1634_v37  ;;  %v1686_v30 = vld [vmem:[#allocation2 + $0x30] sm:$0xff] }
  0x1e   :  { %v221_v45 = vand.u32 4294901760, %v220_v35  ;;  %v228_v48 = vand.u32 4294901760, %v227_v40  ;;  %v346_v49 = vsub.f32 %v1613_v32, %v2335_v41  ;;  %v353_v50 = vsub.f32 %v1618_v33, %v2334_v42 }
  0x1f   :  { %v150_v51 = vand.u32 4294901760, %v1636_v38  ;;  %v1302_v52 = vpack.c.bf16 %v340_v44, %v333_v39  ;;  %v234_v53 = vsub.f32 %v1629_v36, %v2332_v46  ;;  %v241_v54 = vsub.f32 %v1634_v37, %v2331_v47 }
  0x20   :  { %v153_v55 = vand.u32 4294901760, %v1643_v43  ;;  %v1304_v58 = vpack.c.bf16 %v228_v48, %v221_v45  ;;  %v347_v59 = vand.u32 4294901760, %v346_v49  ;;  %v354_v60 = vand.u32 4294901760, %v353_v50 }
  0x21   :  { %v1668_v61 = vsub.f32 %v1636_v38, %v150_v51  ;;  %1303 = vmatprep.subr.bf16.mxu1 %v1302_v52  ;;  %v235_v63 = vand.u32 4294901760, %v234_v53  ;;  %v242_v0 = vand.u32 4294901760, %v241_v54  ;;  %v1679_v2 = vpack.c.bf16 %v141_v10, %v138_v5 }
  0x22   :  { %v1675_v1 = vsub.f32 %v1643_v43, %v153_v55  ;;  %1305 = vmatpush3.bf16.msra.mxu1 %v1304_v58  ;;  %v1306_v8 = vpack.c.bf16 %v354_v60, %v347_v59  ;;  %v102_v18 = vand.u32 4294901760, %v1661_v56  ;;  %v105_v19 = vand.u32 4294901760, %v1663_v57 }
  0x23   :  { %v2330_v9 = vand.u32 4294901760, %v1668_v61  ;;  %v1308_v34 = vpack.c.bf16 %v242_v0, %v235_v63  ;;  %1271 = vmatprep.subr.bf16.mxu0 %v1679_v2  ;;  %v1694_v3 = vpack.c.bf16 %v93_v15, %v90_v11  ;;  %v156_v5 = vand.u32 4294901760, %v1670_v62  ;;  %v1711_v11 = vld [vmem:[#allocation2 + $0x38] sm:$0xff]  ;;  %v1759_v63 = vld [vmem:[#allocation2 + $0xc8] sm:$0xff] }
  0x24   :  { %v2327_v35 = vand.u32 4294901760, %v1675_v1  ;;  %1307 = vmatprep.subr.bf16.mxu1 %v1306_v8  ;;  %v1703_v39 = vsub.f32 %v1661_v56, %v102_v18  ;;  %v1708_v6 = vsub.f32 %v1663_v57, %v105_v19  ;;  %v159_v7 = vand.u32 4294901760, %v1681_v4 }
  0x25   :  { %v360_v10 = vsub.f32 %v1668_v61, %v2330_v9  ;;  %1273 = vmatpush3.bf16.msra.mxu0 %v1694_v3  ;;  %v1720_v40 = vsub.f32 %v1670_v62, %v156_v5  ;;  %v1726_v44 = vpack.c.bf16 %v147_v25, %v144_v24  ;;  %v108_v45 = vand.u32 4294901760, %v1686_v30  ;;  %v1744_v25 = vld [vmem:[#allocation2 + $0xc0] sm:$0xff] }
  0x26   :  { %v367_v15 = vsub.f32 %v1675_v1, %v2327_v35  ;;  %1309 = vmatpush3.bf16.msra.mxu1 %v1308_v34  ;;  %v2325_v49 = vand.u32 4294901760, %v1703_v39  ;;  %v2323_v50 = vand.u32 4294901760, %v1708_v6  ;;  %v1734_v52 = vsub.f32 %v1681_v4, %v159_v7 }
  0x27   :  { %v361_v48 = vand.u32 4294901760, %v360_v10  ;;  %v2322_v12 = vand.u32 4294901760, %v1720_v40  ;;  %1275 = vmatprep.subr.bf16.mxu0 %v1726_v44  ;;  %v111_v13 = vand.u32 4294901760, %v1711_v11  ;;  %v1742_v24 = vsub.f32 %v1686_v30, %v108_v45 }
  0x28   :  { %v368_v53 = vand.u32 4294901760, %v367_v15  ;;  %v248_v54 = vsub.f32 %v1703_v39, %v2325_v49  ;;  %v255_v58 = vsub.f32 %v1708_v6, %v2323_v50  ;;  %v2324_v59 = vand.u32 4294901760, %v1734_v52 }
  0x29   :  { %v1757_v60 = vpack.c.bf16 %v99_v29, %v96_v28  ;;  %v374_v8 = vsub.f32 %v1720_v40, %v2322_v12  ;;  %v2326_v34 = vand.u32 4294901760, %v1742_v24  ;;  %v1768_v10 = vsub.f32 %v1711_v11, %v111_v13  ;;  %v1775_v29 = vld [vmem:[#allocation2 + $0x40] sm:$0xff] }
  0x2a   :  { %v1310_v0 = vpack.c.bf16 %v368_v53, %v361_v48  ;;  %v249_v15 = vand.u32 4294901760, %v248_v54  ;;  %v256_v16 = vand.u32 4294901760, %v255_v58  ;;  %v381_v17 = vsub.f32 %v1734_v52, %v2324_v59  ;;  %v1782_v58 = vld [vmem:[#allocation2 + $0x48] sm:$0xff] }
  0x2b   :  { %1277 = vmatpush3.bf16.msra.mxu0 %v1757_v60  ;;  %v162_v28 = vand.u32 4294901760, %v1744_v25  ;;  %v375_v48 = vand.u32 4294901760, %v374_v8  ;;  %v262_v53 = vsub.f32 %v1742_v24, %v2326_v34  ;;  %v2328_v12 = vand.u32 4294901760, %v1768_v10  ;;  %v1795_v8 = vld [vmem:[#allocation2 + $0xd0] sm:$0xff] }
  0x2c   :  { %1311 = vmatprep.subr.bf16.mxu1 %v1310_v0  ;;  %v165_v54 = vand.u32 4294901760, %v1759_v63  ;;  %v1312_v50 = vpack.c.bf16 %v256_v16, %v249_v15  ;;  %v382_v59 = vand.u32 4294901760, %v381_v17  ;;  %v1793_v0 = vpack.c.bf16 %v153_v55, %v150_v51  ;;  %v1806_v17 = vld [vmem:[#allocation2 + $0xd8] sm:$0xff] }
  0x2d   :  { %v1787_v49 = vsub.f32 %v1744_v25, %v162_v28  ;;  %v263_v34 = vand.u32 4294901760, %v262_v53  ;;  %v269_v35 = vsub.f32 %v1768_v10, %v2328_v12  ;;  %v114_v16 = vand.u32 4294901760, %v1775_v29 }
  0x2e   :  { %v1803_v15 = vsub.f32 %v1759_v63, %v165_v54  ;;  %1313 = vmatpush3.bf16.msra.mxu1 %v1312_v50  ;;  %v1314_v38 = vpack.c.bf16 %v382_v59, %v375_v48  ;;  %1279 = vmatprep.subr.bf16.mxu0 %v1793_v0  ;;  %v117_v51 = vand.u32 4294901760, %v1782_v58  ;;  %v1815_v55 = vpack.c.bf16 %v105_v19, %v102_v18  ;;  %v1824_v48 = vld [vmem:[#allocation2 + $0x50] sm:$0xff] }
  0x2f   :  { %v2329_v43 = vand.u32 4294901760, %v1787_v49  ;;  %v270_v53 = vand.u32 4294901760, %v269_v35  ;;  %v1821_v50 = vsub.f32 %v1775_v29, %v114_v16  ;;  %v2350_v59 = vand.u32 4294901760, %v1795_v8  ;;  %v1842_v35 = vld [vmem:[#allocation2 + $0x58] sm:$0xff]  ;;  %v66_v63 = vld [vmem:[#allocation2 + $0xf0] sm:$0xff] }
  0x30   :  { %v2333_v12 = vand.u32 4294901760, %v1803_v15  ;;  %1315 = vmatprep.subr.bf16.mxu1 %v1314_v38  ;;  %v1832_v57 = vsub.f32 %v1782_v58, %v117_v51  ;;  %1281 = vmatpush3.bf16.msra.mxu0 %v1815_v55  ;;  %v2349_v18 = vand.u32 4294901760, %v1806_v17  ;;  %v1840_v19 = vpack.c.bf16 %v159_v7, %v156_v5 }
  0x31   :  { %v388_v56 = vsub.f32 %v1787_v49, %v2329_v43  ;;  %v1316_v38 = vpack.c.bf16 %v270_v53, %v263_v34  ;;  %v2336_v9 = vand.u32 4294901760, %v1821_v50  ;;  %v1851_v47 = vsub.f32 %v1795_v8, %v2350_v59 }
  0x32   :  { %2373 = vst [vmem:[#allocation8_spill] sm:$0xff] %v1840_v19  ;;  %v395_v43 = vsub.f32 %v1803_v15, %v2333_v12  ;;  %v2339_v62 = vand.u32 4294901760, %v1832_v57  ;;  %v1857_v4 = vsub.f32 %v1806_v17, %v2349_v18  ;;  %1283 = vmatprep.subr.bf16.mxu0 %v1840_v19  ;;  %v2345_v5 = vand.u32 4294901760, %v1824_v48  ;;  %v1866_v12 = vld [vmem:[#allocation2 + $0xe0] sm:$0xff] }
  0x33   :  { %v389_v46 = vand.u32 4294901760, %v388_v56  ;;  %1317 = vmatpush3.bf16.msra.mxu1 %v1316_v38  ;;  %v276_v34 = vsub.f32 %v1821_v50, %v2336_v9  ;;  %v2343_v53 = vand.u32 4294901760, %v1851_v47  ;;  %v2344_v56 = vand.u32 4294901760, %v1842_v35  ;;  %v1883_v9 = vld [vmem:[#allocation2 + $0xe8] sm:$0xff] }
  0x34   :  { %v396_v7 = vand.u32 4294901760, %v395_v43  ;;  %v283_v42 = vsub.f32 %v1832_v57, %v2339_v62  ;;  %v2342_v41 = vand.u32 4294901760, %v1857_v4  ;;  %v1875_v43 = vsub.f32 %v1824_v48, %v2345_v5 }
  0x35   :  { %v1881_v38 = vpack.c.bf16 %v111_v13, %v108_v45  ;;  %v277_v27 = vand.u32 4294901760, %v276_v34  ;;  %v402_v62 = vsub.f32 %v1851_v47, %v2343_v53  ;;  %v1891_v26 = vsub.f32 %v1842_v35, %v2344_v56  ;;  %v1899_v45 = vld [vmem:[#allocation2 + $0x60] sm:$0xff]  ;;  %v1901_v13 = vld [vmem:[#allocation2 + $0x68] sm:$0xff] }
  0x36   :  { %v1318_v31 = vpack.c.bf16 %v396_v7, %v389_v46  ;;  %v284_v22 = vand.u32 4294901760, %v283_v42  ;;  %v409_v30 = vsub.f32 %v1857_v4, %v2342_v41  ;;  %v2346_v11 = vand.u32 4294901760, %v1875_v43 }
  0x37   :  { %2374 = vst [vmem:[#allocation9_spill] sm:$0xff] %v1881_v38  ;;  %1285 = vmatpush3.bf16.msra.mxu0 %v1881_v38  ;;  %v2348_v46 = vand.u32 4294901760, %v1866_v12  ;;  %v403_v7 = vand.u32 4294901760, %v402_v62  ;;  %v2347_v34 = vand.u32 4294901760, %v1891_v26  ;;  %v177_v42 = vand.u32 4294901760, %v1883_v9 }
  0x38   :  { %1319 = vmatprep.subr.bf16.mxu1 %v1318_v31  ;;  %v1909_v41 = vpack.c.bf16 %v165_v54, %v162_v28  ;;  %v1320_v53 = vpack.c.bf16 %v284_v22, %v277_v27  ;;  %v410_v56 = vand.u32 4294901760, %v409_v30  ;;  %v290_v5 = vsub.f32 %v1875_v43, %v2346_v11  ;;  %v67_v28 = vld [vmem:[#allocation2 + $0xf8] sm:$0xff] }
  0x39   :  { %v1917_v31 = vsub.f32 %v1866_v12, %v2348_v46  ;;  %v297_v62 = vsub.f32 %v1891_v26, %v2347_v34  ;;  %v1923_v25 = vsub.f32 %v1883_v9, %v177_v42  ;;  %v126_v22 = vand.u32 4294901760, %v1899_v45 }
  0x3a   :  { %2375 = vst [vmem:[#allocation10_spill] sm:$0xff] %v1909_v41  ;;  %1287 = vmatprep.subr.bf16.mxu0 %v1909_v41  ;;  %v129_v27 = vand.u32 4294901760, %v1901_v13  ;;  %1321 = vmatpush3.bf16.msra.mxu1 %v1320_v53  ;;  %v1322_v54 = vpack.c.bf16 %v410_v56, %v403_v7  ;;  %v291_v30 = vand.u32 4294901760, %v290_v5  ;;  %v1933_v34 = vpack.c.bf16 %v117_v51, %v114_v16  ;;  %v50_v53 = vld [vmem:[#allocation2 + $0x70] sm:$0xff] }
  0x3b   :  { %v2351_v11 = vand.u32 4294901760, %v1917_v31  ;;  %v298_v9 = vand.u32 4294901760, %v297_v62  ;;  %v2356_v46 = vand.u32 4294901760, %v1923_v25  ;;  %v1937_v18 = vsub.f32 %v1899_v45, %v126_v22  ;;  %v51_v45 = vld [vmem:[#allocation2 + $0x78] sm:$0xff] }
  0x3c   :  { %2376 = vst [vmem:[#allocation11_spill] sm:$0xff] %v1933_v34  ;;  %v1940_v59 = vsub.f32 %v1901_v13, %v129_v27  ;;  %1323 = vmatprep.subr.bf16.mxu1 %v1322_v54  ;;  %1289 = vmatpush3.bf16.msra.mxu0 %v1933_v34  ;;  %v180_v29 = vand.u32 4294901760, %v66_v63  ;;  %v183_v58 = vand.u32 4294901760, %v67_v28  ;;  %v2377_v16 = vand.u32 4294901760, %v1795_v8 }
  0x3d   :  { %v416_v5 = vsub.f32 %v1917_v31, %v2351_v11  ;;  %v2378_v51 = vand.u32 4294901760, %v1806_v17  ;;  %v1324_v7 = vpack.c.bf16 %v298_v9, %v291_v30  ;;  %v423_v13 = vsub.f32 %v1923_v25, %v2356_v46 }
  0x3e   :  { %v2359_v62 = vand.u32 4294901760, %v1937_v18  ;;  %v2362_v54 = vand.u32 4294901760, %v1940_v59  ;;  %v1957_v34 = vsub.f32 %v66_v63, %v180_v29  ;;  %v1959_v41 = vsub.f32 %v67_v28, %v183_v58 }
  0x3f   :  { %v1950_v56 = vpack.c.bf16 %v2378_v51, %v2377_v16  ;;  %v417_v11 = vand.u32 4294901760, %v416_v5  ;;  %v132_v8 = vand.u32 4294901760, %v50_v53  ;;  %1325 = vmatpush3.bf16.msra.mxu1 %v1324_v7  ;;  %v424_v17 = vand.u32 4294901760, %v423_v13 }
  0x40   :  { %v304_v30 = vsub.f32 %v1937_v18, %v2359_v62  ;;  %v311_v9 = vsub.f32 %v1940_v59, %v2362_v54  ;;  %v135_v16 = vand.u32 4294901760, %v51_v45  ;;  %v2366_v5 = vand.u32 4294901760, %v1957_v34 }
  0x41   :  { %2379 = vst [vmem:[#allocation12_spill] sm:$0xff] %v1950_v56  ;;  %1291 = vmatprep.subr.bf16.mxu0 %v1950_v56  ;;  %v2365_v63 = vand.u32 4294901760, %v1959_v41  ;;  %v1970_v28 = vsub.f32 %v50_v53, %v132_v8  ;;  %v2380_v51 = vand.u32 4294901760, %v1824_v48  ;;  %v2381_v7 = vand.u32 4294901760, %v1842_v35 }
  0x42   :  { %v1326_v46 = vpack.c.bf16 %v424_v17, %v417_v11  ;;  %v305_v56 = vand.u32 4294901760, %v304_v30  ;;  %v312_v62 = vand.u32 4294901760, %v311_v9  ;;  %v1978_v38 = vsub.f32 %v51_v45, %v135_v16 }
  0x43   :  { %v1976_v13 = vpack.c.bf16 %v2381_v7, %v2380_v51  ;;  %v430_v54 = vsub.f32 %v1957_v34, %v2366_v5  ;;  %v437_v53 = vsub.f32 %v1959_v41, %v2365_v63  ;;  %v317_v19 = vand.u32 4294901760, %v1970_v28 }
  0x44   :  { %1327 = vmatprep.subr.bf16.mxu1 %v1326_v46  ;;  %v1328_v48 = vpack.c.bf16 %v312_v62, %v305_v56  ;;  %v324_v35 = vand.u32 4294901760, %v1978_v38  ;;  %v2382_v11 = vand.u32 4294901760, %v1866_v12  ;;  %v1993_v17 = vpack.c.bf16 %v129_v27, %v126_v22 }
  0x45   :  { %1293 = vmatpush3.bf16.msra.mxu0 %v1976_v13  ;;  %v431_v30 = vand.u32 4294901760, %v430_v54  ;;  %v438_v9 = vand.u32 4294901760, %v437_v53  ;;  %v318_v51 = vsub.f32 %v1970_v28, %v317_v19  ;;  %v1996_v7 = vpack.c.bf16 %v183_v58, %v180_v29 }
  0x46   :  { %v1991_v45 = vpack.c.bf16 %v177_v42, %v2382_v11  ;;  %1329 = vmatpush3.bf16.msra.mxu1 %v1328_v48  ;;  %v325_v63 = vsub.f32 %v1978_v38, %v324_v35  ;;  %v2000_v46 = vpack.c.bf16 %v135_v16, %v132_v8  ;;  %v1334_v12 = vpack.c.bf16 %v1587_v20, %v1579_v14 }
  0x47   :  { %v1330_v42 = vpack.c.bf16 %v438_v9, %v431_v30  ;;  %v319_v56 = vand.u32 4294901760, %v318_v51  ;;  %v2384_v11 = vand.u32 4294901760, %v1587_v20  ;;  %v2385_v9 = vand.u32 4294901760, %v1592_v21 }
  0x48   :  { %1295 = vmatprep.subr.bf16.mxu0 %v1991_v45  ;;  %v326_v29 = vand.u32 4294901760, %v325_v63  ;;  %v2386_v30 = vand.u32 4294901760, %v1598_v23  ;;  %v2387_v51 = vand.u32 4294901760, %v1613_v32  ;;  %v2390_v20 = vand.u32 4294901760, %v1634_v37 }
  0x49   :  { %1297 = vmatpush3.bf16.msra.mxu0 %v1993_v17  ;;  %1331 = vmatprep.subr.bf16.mxu1 %v1330_v42  ;;  %v2388_v42 = vand.u32 4294901760, %v1618_v33  ;;  %v2402_v8 = vand.u32 4294901760, %v1768_v10 }
  0x4a   :  { %1299 = vmatprep.subr.bf16.mxu0 %v1996_v7  ;;  %v1332_v48 = vpack.c.bf16 %v326_v29, %v319_v56  ;;  %v2383_v29 = vand.u32 4294901760, %v1579_v14  ;;  %v2047_v63 = vpack.c.bf16 %v2386_v30, %v2385_v9  ;;  %v2389_v14 = vand.u32 4294901760, %v1629_v36 }
  0x4b   :  { %v2053_v16 = vpack.c.bf16 %v2388_v42, %v2387_v51  ;;  %v2395_v9 = vand.u32 4294901760, %v1703_v39  ;;  %v2398_v42 = vand.u32 4294901760, %v1720_v40  ;;  %v2399_v56 = vand.u32 4294901760, %v1734_v52 }
  0x4c   :  { %v2041_v53 = vpack.c.bf16 %v2384_v11, %v2383_v29  ;;  %1333 = vmatpush3.bf16.msra.mxu1 %v1332_v48  ;;  %v2059_v11 = vpack.c.bf16 %v2390_v20, %v2389_v14  ;;  %v2393_v48 = vand.u32 4294901760, %v1675_v1  ;;  %v2396_v29 = vand.u32 4294901760, %v1708_v6 }
  0x4d   :  { %1301 = vmatpush3.bf16.msra.mxu0 %v2000_v46  ;;  %1367 = vmatprep.subr.bf16.mxu1 %v1679_v2  ;;  %v2078_v14 = vpack.c.bf16 %v2399_v56, %v2398_v42  ;;  %v2401_v20 = vand.u32 4294901760, %v1742_v24  ;;  %v2410_v56 = vand.u32 4294901760, %v1851_v47  ;;  %v2411_v42 = vand.u32 4294901760, %v1857_v4 }
  0x4e   :  { %1335 = vmatprep.subr.bf16.mxu0 %v1334_v12  ;;  %2391 = vst [vmem:[#allocation13_spill] sm:$0xff] %v2059_v11  ;;  %v2392_v12 = vand.u32 4294901760, %v1668_v61  ;;  %v2072_v51 = vpack.c.bf16 %v2396_v29, %v2395_v9  ;;  %v2407_v9 = vand.u32 4294901760, %v1821_v50  ;;  %v2408_v29 = vand.u32 4294901760, %v1832_v57 }
  0x4f   :  { %2400 = vst [vmem:[#allocation16_spill] sm:$0xff] %v2078_v14  ;;  %v2084_v54 = vpack.c.bf16 %v2402_v8, %v2401_v20  ;;  %v2102_v27 = vpack.c.bf16 %v2411_v42, %v2410_v56  ;;  %v2413_v8 = vand.u32 4294901760, %v1875_v43  ;;  %v2414_v20 = vand.u32 4294901760, %v1891_v26 }
  0x50   :  { %v2066_v30 = vpack.c.bf16 %v2393_v48, %v2392_v12  ;;  %2397 = vst [vmem:[#allocation15_spill] sm:$0xff] %v2072_v51  ;;  %v2404_v12 = vand.u32 4294901760, %v1787_v49  ;;  %v2405_v48 = vand.u32 4294901760, %v1803_v15  ;;  %v2096_v58 = vpack.c.bf16 %v2408_v29, %v2407_v9 }
  0x51   :  { %2403 = vst [vmem:[#allocation17_spill] sm:$0xff] %v2084_v54  ;;  %2412 = vst [vmem:[#allocation20_spill] sm:$0xff] %v2102_v27  ;;  %v2108_v22 = vpack.c.bf16 %v2414_v20, %v2413_v8  ;;  %v2419_v9 = vand.u32 4294901760, %v1937_v18  ;;  %v2420_v29 = vand.u32 4294901760, %v1940_v59  ;;  %v2422_v56 = vand.u32 4294901760, %v1957_v34 }
  0x52   :  { %2394 = vst [vmem:[#allocation14_spill] sm:$0xff] %v2066_v30  ;;  %v2090_v62 = vpack.c.bf16 %v2405_v48, %v2404_v12  ;;  %2409 = vst [vmem:[#allocation19_spill] sm:$0xff] %v2096_v58  ;;  %v2416_v12 = vand.u32 4294901760, %v1917_v31  ;;  %v2417_v48 = vand.u32 4294901760, %v1923_v25  ;;  %v2423_v42 = vand.u32 4294901760, %v1959_v41 }
  0x53   :  { %2415 = vst [vmem:[#allocation21_spill] sm:$0xff] %v2108_v22  ;;  %v2120_v58 = vpack.c.bf16 %v2420_v29, %v2419_v9  ;;  %v2128_v8 = vpack.c.bf16 %v324_v35, %v317_v19  ;;  %v68_v20 = vlaneseq  ;;  %v1522_v9 = vmov 0.0  }
  0x54   :  { %2406 = vst [vmem:[#allocation18_spill] sm:$0xff] %v2090_v62  ;;  %v2114_v5 = vpack.c.bf16 %v2417_v48, %v2416_v12  ;;  %v2126_v27 = vpack.c.bf16 %v2423_v42, %v2422_v56  ;;  %v2367_v29 = vmov 1.0  }
  0x55   :  { %2421 = vst [vmem:[#allocation23_spill] sm:$0xff] %v2120_v58  ;;  %2425 = vst [vmem:[#allocation25_spill] sm:$0xff] %v2128_v8  ;;  %v2130_v22 = vand.u32 127, %v68_v20 }
  0x56   :  { %2418 = vst [vmem:[#allocation22_spill] sm:$0xff] %v2114_v5  ;;  %2424 = vst [vmem:[#allocation24_spill] sm:$0xff] %v2126_v27  ;;  %v2428_v27 = vmov 1.0  }
  0x57   :  { %2426 = vst [vmem:[#allocation26_spill] sm:$0xff] %v2130_v22  ;;  %v2133_v12 = vadd.s32 128, %v2130_v22 }
  0x97   :  { %v2135_v48 = vpop.permute.xlu0 %72 }
  0x98   :  { %vm77_vm4 = vcmp.eq.s32.totalorder %v2135_v48, %v2130_v22  ;;  %vm78_vm5 = vcmp.eq.s32.totalorder %v2135_v48, %v2133_v12 }
  0x99   :  { %v1026_v19 = vsel %vm77_vm4, 1.0, %v1522_v9  ;;  %v1027_v35 = vsel %vm78_vm5, 1.0, %v1522_v9  ;;  %1030 = vmatprep.mubr.msk.f32.mxu1 %vm78_vm5, %v2367_v29 }
  0x9a   :  { %v186_v56 = vsub.f32 %v1027_v35, %v1027_v35  ;;  %v2151_v42 = vsub.f32 %v1026_v19, %v1026_v19  ;;  %1031 = vmatmul.mubr.msk.f32.vlgmr.msra.gmra.mrb[0].mxu1 %vm77_vm4, %v2367_v29 }
  0x9b   :  { %1369 = vmatpush3.bf16.msra.mxu1 %v1694_v3  ;;  %v2158_v20 = vpop.permute.xlu0 %75 }
  0x9c   :  { %2427 = vst [vmem:[#allocation27_spill] sm:$0xff] %v2158_v20  ;;  %vm79_vm6 = vcmp.eq.s32.totalorder %v2158_v20, %v2130_v22  ;;  %vm80_vm7 = vcmp.eq.s32.totalorder %v2158_v20, %v2133_v12  ;;  %1371 = vmatprep.subr.bf16.mxu1 %v1726_v44  ;;  %v187_v35 = vand.u32 4294901760, %v186_v56  ;;  %v193_v19 = vand.u32 4294901760, %v2151_v42  ;;  %v2430_v22 = vld [vmem:[#allocation8_spill] sm:$0xff] }
  0x9d   :  { %v1028_v8 = vsel %vm79_vm6, 1.0, %v1522_v9  ;;  %v1029_v29 = vsel %vm80_vm7, 1.0, %v1522_v9  ;;  %1032 = vmatprep.mubr.msk.f32.mxu1 %vm80_vm7, %v2428_v27  ;;  %v2429_v20 = vpack.c.bf16 %v1598_v23, %v1592_v21  ;;  %v2435_v21 = vpack.c.bf16 %v1675_v1, %v1668_v61  ;;  %v2436_v23 = vld [vmem:[#allocation11_spill] sm:$0xff] }
  0x9e   :  { %v201_v58 = vsub.f32 %v1029_v29, %v1029_v29  ;;  %v207_v5 = vsub.f32 %v1028_v8, %v1028_v8  ;;  %1033 = vmatmul.mubr.msk.f32.gmra.mrb[2].mxu1 %vm79_vm6, %v2428_v27  ;;  %v188_v62 = vsub.f32 %v186_v56, %v187_v35  ;;  %v194_v54 = vsub.f32 %v2151_v42, %v193_v19 }
  0x9f   :  { %1373 = vmatpush3.bf16.msra.mxu1 %v1757_v60  ;;  %701 = vmatprep.mubr.f32.mxu1 %v187_v35  ;;  %v2442_v61 = vpack.c.bf16 %v1832_v57, %v1821_v50  ;;  %v2443_v1 = vpack.c.bf16 %v1857_v4, %v1851_v47  ;;  %v2446_v47 = vpack.c.bf16 %v1940_v59, %v1937_v18  ;;  %v2461_v50 = vld [vmem:[#allocation23_spill] sm:$0xff]  ;;  %v2462_v59 = vld [vmem:[#allocation24_spill] sm:$0xff]  ;;  %v2463_v57 = vld [vmem:[#allocation25_spill] sm:$0xff] }
  0xa0   :  { %1375 = vmatprep.subr.bf16.mxu1 %v1793_v0  ;;  %v189_v9 = vand.u32 4294901760, %v188_v62  ;;  %v195_v14 = vand.u32 4294901760, %v194_v54  ;;  %v202_v51 = vand.u32 4294901760, %v201_v58  ;;  %v208_v30 = vand.u32 4294901760, %v207_v5  ;;  %v2432_v54 = vld [vmem:[#allocation9_spill] sm:$0xff] }
  0xa1   :  { %v2431_v62 = vpack.c.bf16 %v1618_v33, %v1613_v32  ;;  %v2437_v32 = vpack.c.bf16 %v1708_v6, %v1703_v39  ;;  %v2438_v33 = vld [vmem:[#allocation12_spill] sm:$0xff]  ;;  %v2444_v39 = vpack.c.bf16 %v1891_v26, %v1875_v43  ;;  %v2445_v6 = vpack.c.bf16 %v1923_v25, %v1917_v31 }
  0xa2   :  { %190 = vmatprep.mubr.f32.mxu0 %v189_v9  ;;  %v203_v29 = vsub.f32 %v201_v58, %v202_v51  ;;  %v209_v8 = vsub.f32 %v207_v5, %v208_v30  ;;  %v2433_v9 = vpack.c.bf16 %v1634_v37, %v1629_v36  ;;  %v2440_v36 = vpack.c.bf16 %v1768_v10, %v1742_v24  ;;  %v2455_v24 = vld [vmem:[#allocation19_spill] sm:$0xff]  ;;  %v2457_v10 = vld [vmem:[#allocation21_spill] sm:$0xff] }
  0xa3   :  { %1377 = vmatpush3.bf16.msra.mxu1 %v1815_v55  ;;  %196 = vmatmul.mubr.f32.vlgmr.msra.gmra.mrb[0].mxu0 %v195_v14  ;;  %v2434_v14 = vld [vmem:[#allocation10_spill] sm:$0xff]  ;;  %v2441_v37 = vpack.c.bf16 %v1803_v15, %v1787_v49  ;;  %v2447_v26 = vpack.c.bf16 %v1959_v41, %v1957_v34  ;;  %v2449_v41 = vld [vmem:[#allocation13_spill] sm:$0xff] }
  0xa4   :  { %1337 = vmatpush3.bf16.msra.mxu0 %v2429_v20  ;;  %1379 = vmatprep.subr.bf16.mxu1 %v2430_v22  ;;  %v204_v11 = vand.u32 4294901760, %v203_v29  ;;  %v210_v35 = vand.u32 4294901760, %v209_v8  ;;  %v2453_v49 = vld [vmem:[#allocation17_spill] sm:$0xff] }
  0xa5   :  { %1339 = vmatprep.subr.bf16.mxu0 %v2431_v62 }
  0xa6   :  { %205 = vmatprep.mubr.f32.mxu0 %v204_v11  ;;  %v2439_v11 = vpack.c.bf16 %v1734_v52, %v1720_v40  ;;  %v2451_v40 = vld [vmem:[#allocation15_spill] sm:$0xff]  ;;  %v2454_v52 = vld [vmem:[#allocation18_spill] sm:$0xff] }
  0xa7   :  { %1381 = vmatpush3.bf16.msra.mxu1 %v2432_v54  ;;  %211 = vmatmul.mubr.f32.gmra.mrb[2].mxu0 %v210_v35 }
  0xa8   :  { %1341 = vmatpush3.bf16.msra.mxu0 %v2433_v9  ;;  %585 = vmatprep.mubr.f32.mxu0 %v186_v56 }
  0xa9   :  { %1383 = vmatprep.subr.bf16.mxu1 %v2434_v14  ;;  %1343 = vmatprep.subr.bf16.mxu0 %v2435_v21 }
  0xab   :  { %1385 = vmatpush3.bf16.msra.mxu1 %v2436_v23 }
  0xac   :  { %1345 = vmatpush3.bf16.msra.mxu0 %v2437_v32  ;;  %1387 = vmatprep.subr.bf16.mxu1 %v2438_v33 }
  0xad   :  { %1347 = vmatprep.subr.bf16.mxu0 %v2439_v11 }
  0xaf   :  { %1389 = vmatpush3.bf16.msra.mxu1 %v1976_v13 }
  0xb0   :  { %1349 = vmatpush3.bf16.msra.mxu0 %v2440_v36  ;;  %1391 = vmatprep.subr.bf16.mxu1 %v1991_v45 }
  0xb1   :  { %1351 = vmatprep.subr.bf16.mxu0 %v2441_v37 }
  0xb3   :  { %1393 = vmatpush3.bf16.msra.mxu1 %v1993_v17 }
  0xb4   :  { %1353 = vmatpush3.bf16.msra.mxu0 %v2442_v61  ;;  %1395 = vmatprep.subr.bf16.mxu1 %v1996_v7 }
  0xb5   :  { %1355 = vmatprep.subr.bf16.mxu0 %v2443_v1 }
  0xb7   :  { %1397 = vmatpush3.bf16.msra.mxu1 %v2000_v46 }
  0xb8   :  { %1357 = vmatpush3.bf16.msra.mxu0 %v2444_v39  ;;  %1431 = vmatprep.subr.bf16.mxu1 %v1679_v2  ;;  %v2448_v2 = vpack.c.bf16 %v1978_v38, %v1970_v28 }
  0xb9   :  { %1359 = vmatprep.subr.bf16.mxu0 %v2445_v6 }
  0xba   :  { %705 = vmatmul.mubr.f32.vlgmr.msra.gmra.mrb[4].mxu1 %v193_v19 }
  0xbb   :  { %712 = vmatprep.mubr.f32.mxu1 %v202_v51  ;;  %1433 = vmatpush3.bf16.msra.mxu1 %v1694_v3  ;;  %v2450_v3 = vld [vmem:[#allocation14_spill] sm:$0xff] }
  0xbc   :  { %1361 = vmatpush3.bf16.msra.mxu0 %v2446_v47  ;;  %1435 = vmatprep.subr.bf16.mxu1 %v1726_v44  ;;  %v2452_v44 = vld [vmem:[#allocation16_spill] sm:$0xff] }
  0xbd   :  { %1363 = vmatprep.subr.bf16.mxu0 %v2447_v26 }
  0xbe   :  { %716 = vmatmul.mubr.f32.gmra.mrb[6].mxu1 %v208_v30 }
  0xbf   :  { %1437 = vmatpush3.bf16.msra.mxu1 %v1757_v60  ;;  %1038 = vmatprep.mubr.msk.f32.mxu1 %vm78_vm5, %v2428_v27  ;;  %v2456_v60 = vld [vmem:[#allocation20_spill] sm:$0xff] }
  0xc0   :  { %1365 = vmatpush3.bf16.msra.mxu0 %v2448_v2  ;;  %1439 = vmatprep.subr.bf16.mxu1 %v1793_v0  ;;  %v2458_v0 = vld [vmem:[#allocation22_spill] sm:$0xff] }
  0xc1   :  { %1399 = vmatprep.subr.bf16.mxu0 %v2041_v53 }
  0xc3   :  { %588 = vmatmul.mubr.f32.vlgmr.msra.gmra.mrb[4].mxu0 %v2151_v42  ;;  %1441 = vmatpush3.bf16.msra.mxu1 %v1815_v55 }
  0xc4   :  { %594 = vmatprep.mubr.f32.mxu0 %v201_v58  ;;  %1401 = vmatpush3.bf16.msra.mxu0 %v2047_v63 }
  0xc5   :  { %1443 = vmatprep.subr.bf16.mxu1 %v2430_v22  ;;  %1403 = vmatprep.subr.bf16.mxu0 %v2053_v16 }
  0xc7   :  { %597 = vmatmul.mubr.f32.gmra.mrb[6].mxu0 %v207_v5  ;;  %1445 = vmatpush3.bf16.msra.mxu1 %v2432_v54 }
  0xc8   :  { %1405 = vmatpush3.bf16.msra.mxu0 %v2449_v41  ;;  %1034 = vmatprep.mubr.msk.f32.mxu0 %vm78_vm5, %v2428_v27 }
  0xc9   :  { %1447 = vmatprep.subr.bf16.mxu1 %v2434_v14  ;;  %1407 = vmatprep.subr.bf16.mxu0 %v2450_v3 }
  0xcb   :  { %1449 = vmatpush3.bf16.msra.mxu1 %v2436_v23 }
  0xcc   :  { %1409 = vmatpush3.bf16.msra.mxu0 %v2451_v40  ;;  %1451 = vmatprep.subr.bf16.mxu1 %v2438_v33 }
  0xcd   :  { %1411 = vmatprep.subr.bf16.mxu0 %v2452_v44 }
  0xcf   :  { %1453 = vmatpush3.bf16.msra.mxu1 %v1976_v13 }
  0xd0   :  { %1413 = vmatpush3.bf16.msra.mxu0 %v2453_v49  ;;  %1455 = vmatprep.subr.bf16.mxu1 %v1991_v45 }
  0xd1   :  { %1415 = vmatprep.subr.bf16.mxu0 %v2454_v52 }
  0xd3   :  { %1457 = vmatpush3.bf16.msra.mxu1 %v1993_v17 }
  0xd4   :  { %1417 = vmatpush3.bf16.msra.mxu0 %v2455_v24  ;;  %1459 = vmatprep.subr.bf16.mxu1 %v1996_v7 }
  0xd5   :  { %1419 = vmatprep.subr.bf16.mxu0 %v2456_v60 }
  0xd7   :  { %1461 = vmatpush3.bf16.msra.mxu1 %v2000_v46 }
  0xd8   :  { %1421 = vmatpush3.bf16.msra.mxu0 %v2457_v10 }
  0xd9   :  { %1423 = vmatprep.subr.bf16.mxu0 %v2458_v0 }
  0xda   :  { %1039 = vmatmul.mubr.msk.f32.vlgmr.msra.gmra.mrb[8].mxu1 %vm77_vm4, %v2428_v27 }
  0xdb   :  { %1040 = vmatprep.mubr.msk.f32.mxu1 %vm80_vm7, %v2428_v27 }
  0xdc   :  { %1425 = vmatpush3.bf16.msra.mxu0 %v2461_v50 }
  0xdd   :  { %1427 = vmatprep.subr.bf16.mxu0 %v2462_v59 }
  0xde   :  { %1041 = vmatmul.mubr.msk.f32.gmra.mrb[10].mxu1 %vm79_vm6, %v2428_v27 }
  0xe0   :  { %1429 = vmatpush3.bf16.msra.mxu0 %v2463_v57 }
  0xe3   :  { %1035 = vmatmul.mubr.msk.f32.vlgmr.msra.gmra.mrb[8].mxu0 %vm77_vm4, %v2428_v27 }
  0xe4   :  { %1036 = vmatprep.mubr.msk.f32.mxu0 %vm80_vm7, %v2428_v27 }
  0xe7   :  { %1037 = vmatmul.mubr.msk.f32.gmra.mrb[10].mxu0 %vm79_vm6, %v2428_v27 }
 0x16d   :  { %v1112_v18 = vpop.f32.mrb[0].mxu1 }
 0x16e   :  { %v1113_v4 = vpop.f32.mrb[1].mxu1 }
 0x16f   :  { %v1114_v43 = vadd.f32 %v1113_v4, %v1112_v18 }
 0x171   :  { %v1115_v38 = vpop.f32.mrb[2].mxu1 }
 0x172   :  { %v1116_v34 = vpop.f32.mrb[3].mxu1 }
 0x173   :  { %v1117_v31 = vadd.f32 %v1116_v34, %v1115_v38 }
 0x176   :  { %v1074_v25 = vpop.f32.mrb[0].mxu0 }
 0x177   :  { %v1075_v5 = vpop.f32.mrb[1].mxu0 }
 0x178   :  { %v1076_v28 = vadd.f32 %v1075_v5, %v1074_v25 }
 0x17a   :  { %v445_v13 = vadd.f32 %v1114_v43, %v1076_v28  ;;  %v1077_v45 = vpop.f32.mrb[2].mxu0 }
 0x17b   :  { %v1078_v17 = vpop.f32.mrb[3].mxu0 }
 0x17c   :  { %v1079_v7 = vadd.f32 %v1078_v17, %v1077_v45 }
 0x17e   :  { %v452_v46 = vadd.f32 %v1117_v31, %v1079_v7 }
 0x18d   :  { %v1188_v22 = vpop.f32.mrb[4].mxu1 }
 0x18e   :  { %v1189_v58 = vpop.f32.mrb[5].mxu1 }
 0x18f   :  { %v1190_v16 = vadd.f32 %v1189_v58, %v1188_v22 }
 0x191   :  { %v1191_v63 = vpop.f32.mrb[6].mxu1 }
 0x192   :  { %v1192_v53 = vpop.f32.mrb[7].mxu1 }
 0x193   :  { %v1193_v27 = vadd.f32 %v1192_v53, %v1191_v63 }
 0x196   :  { %v1150_v30 = vpop.f32.mrb[4].mxu0 }
 0x197   :  { %v1151_v51 = vpop.f32.mrb[5].mxu0 }
 0x198   :  { %v1152_v12 = vadd.f32 %v1151_v51, %v1150_v30 }
 0x19a   :  { %v590_v48 = vadd.f32 %v1152_v12, %v445_v13  ;;  %v1153_v56 = vpop.f32.mrb[6].mxu0 }
 0x19b   :  { %v1154_v42 = vpop.f32.mrb[7].mxu0 }
 0x19c   :  { %v1155_v20 = vadd.f32 %v1154_v42, %v1153_v56  ;;  %v707_v19 = vadd.f32 %v1190_v16, %v590_v48 }
 0x19e   :  { %v599_v29 = vadd.f32 %v1155_v20, %v452_v46 }
 0x1a0   :  { %v718_v8 = vadd.f32 %v1193_v27, %v599_v29 }
 0x1ad   :  { %v1264_v35 = vpop.f32.mrb[8].mxu1 }
 0x1ae   :  { %v1265_v62 = vpop.f32.mrb[9].mxu1 }
 0x1af   :  { %v1266_v54 = vadd.f32 %v1265_v62, %v1264_v35 }
 0x1b1   :  { %v1267_v9 = vpop.f32.mrb[10].mxu1 }
 0x1b2   :  { %v1268_v14 = vpop.f32.mrb[11].mxu1 }
 0x1b3   :  { %v1269_v21 = vadd.f32 %v1268_v14, %v1267_v9 }
 0x1b6   :  { %v1226_v23 = vpop.f32.mrb[8].mxu0 }
 0x1b7   :  { %v1227_v32 = vpop.f32.mrb[9].mxu0 }
 0x1b8   :  { %v1228_v33 = vadd.f32 %v1227_v32, %v1226_v23 }
 0x1ba   :  { %v886_v11 = vadd.f32 %v1228_v33, %v707_v19  ;;  %v1229_v36 = vpop.f32.mrb[10].mxu0 }
 0x1bb   :  { %v1230_v37 = vpop.f32.mrb[11].mxu0 }
 0x1bc   :  { %v997_v61 = vadd.f32 %v1266_v54, %v886_v11  ;;  %v1231_v1 = vadd.f32 %v1230_v37, %v1229_v36 }
 0x1be   :  { %1007 = vst [vmem:[#allocation5] sm:$0xff] %v997_v61  ;;  %v893_v39 = vadd.f32 %v1231_v1, %v718_v8 }
 0x1c0   :  { %v1004_v6 = vadd.f32 %v1269_v21, %v893_v39 }
 0x1c2   :  { %1008 = vst [vmem:[#allocation5 + $0x8] sm:$0xff] %v1004_v6 }
 0x1c3   :  { %1503 = shalt.err (!%p1500_p12)
}
 0x1c4   :  { %s1504_s30 = scalar_lea.hbm %s2321_s2, 256 }
 0x1c5   :  { %p1505_p13 = scmp.ne.s32.totalorder %s2321_s2, %s1504_s30  ;;  %p1508_p0 = scmp.lt.u32.totalorder %s1504_s30, %s2321_s2 }
 0x1c7   :  { %p1510_p1 = pnand %p1508_p0, %p1505_p13 }
 0x1c9   :  { %1513 = shalt.err (!%p1510_p1)
}
 0x1ca   :  { %1020 = dma.vmem_to_hbm [thread:$0]  %s1015_s1, 256, %s2321_s2, [#allocation4], %s1519_s19, %s1519_s19, %s1520_s20  }
 0x1cb   :  { %1516 = dma.done.wait [#allocation4], 256  }
 0x1cc   :  { %1517 = vsyncadd [#allocation4], 4294967040 }
 0x1cd   :  { %1024 = vsyncpa [#allocation3], 1 }
 0x1ce   :  { %1025 = vsyncpa [#allocation4], 1 }

</bundles_post_ra>
